<compile_context>
chip_gen: v5e
topology: v5e:2x2
jax: 0.10.0
libtpu: 0.0.40
codegen_flags: <defaults>
</compile_context>

<pallas_src>
import functools

import jax
import jax.numpy as jnp
from jax import lax
from jax.experimental import pallas as pl
from jax.experimental.pallas import tpu as pltpu

_MIB = 1024 * 1024


def _round_up(n: int, m: int) -> int:
    return ((n + m - 1) // m) * m


def _tpu_vmem_capacity_bytes() -> int:
    """Per-TensorCore VMEM capacity; conservative fallback if query fails."""
    try:
        info = pltpu.get_tpu_info()
        cap = getattr(info, "vmem_capacity_bytes", None)
        if cap:
            return int(cap)
    except Exception:
        pass
    return 64 * _MIB  # v7x per-core size; safe lower bound on v5e/v6e too


def _vmem_limit_bytes(cap: int) -> int:
    # 128-MiB parts (v5e/v6e): use ~100 MiB.  v7x (64 MiB): leave ~12 MiB
    # headroom for compiler-internal scratch.
    if cap >= 96 * _MIB:
        return 100 * _MIB
    return max(cap - 12 * _MIB, 32 * _MIB)


def _default_batch_tile(cap: int) -> int:
    return 512 if cap >= 96 * _MIB else 256


def _pick_vec_tile(vec_p: int, vdim_p: int, w_itemsize: int,
                   weight_budget: int) -> int:
    """Largest multiple-of-128 divisor of vec_p whose weight blocks fit."""
    m = vec_p // 128
    best = 128
    for d in range(1, m + 1):
        if m % d:
            continue
        tvec = 128 * d
        nbuf = 1 if tvec == vec_p else 2  # resident vs double-buffered blocks
        if 2 * vdim_p * tvec * w_itemsize * nbuf <= weight_budget:
            best = tvec
    return best


def _pick_batch_tile(requested: int, b8: int, vdim_p: int, tvec: int,
                     vec_p: int, x_itemsize: int, o_itemsize: int,
                     w_itemsize: int, limit: int) -> int:
    nbuf_w = 1 if tvec == vec_p else 2
    w_bytes = 2 * vdim_p * tvec * w_itemsize * nbuf_w
    tb = max(8, (min(requested, b8) // 8) * 8)
    while tb > 8:
        act_bytes = (2 * tb * vdim_p * x_itemsize      # x, double-buffered
                     + 2 * tb * vdim_p * o_itemsize    # out, double-buffered
                     + tb * vdim_p * 4                 # f32 accumulator
                     + tb * tvec * 4)                  # h intermediate
        if w_bytes + act_bytes <= int(limit * 0.85):
            break
        tb = max(8, ((tb // 2) // 8) * 8)
    return tb


def _mlp_kernel(x_ref, w1_ref, w2_ref, o_ref, acc_ref, *, compute_dtype):
    # x_ref  : (TB, vdim_p)        batch tile (input dtype)
    # w1_ref : (vdim_p, TVEC)      l1.weight^T tile (compute dtype)
    # w2_ref : (TVEC, vdim_p)      l2.weight^T tile (compute dtype)
    # o_ref  : (TB, vdim_p)        output tile
    # acc_ref: (TB, vdim_p) f32    accumulator over the hidden (vec) axis
    jv = pl.program_id(1)

    @pl.when(jv == 0)
    def _():
        acc_ref[...] = jnp.zeros_like(acc_ref)

    x = x_ref[...].astype(compute_dtype)
    # h = x @ W1^T : (TB, TVEC).  Plain (M,K)@(K,N), f32 accumulation.
    h = lax.dot_general(
        x, w1_ref[...],
        dimension_numbers=(((1,), (0,)), ((), ())),
        preferred_element_type=jnp.float32,
    )
    # y += h @ W2^T.  h is intentionally downcast to the compute dtype before
    # the second MXU pass; accumulation stays f32.
    acc_ref[...] += lax.dot_general(
        h.astype(compute_dtype), w2_ref[...],
        dimension_numbers=(((1,), (0,)), ((), ())),
        preferred_element_type=jnp.float32,
    )

    @pl.when(jv == pl.num_programs(1) - 1)
    def _():
        o_ref[...] = acc_ref[...].astype(o_ref.dtype)


def prepare_params(w1, w2, *, compute_dtype=jnp.bfloat16):
    """One-time weight prep (hoisted out of the hot path).

    w1: (vector_dim, vdim)  l1.weight, torch (out, in) layout
    w2: (vdim, vector_dim)  l2.weight, torch (out, in) layout

    Casts to the MXU compute dtype, transposes to (in, out) layout so both
    kernel matmuls are plain (M,K)@(K,N), and zero-pads feature dims to
    multiples of 128 (exact for bias-free linears).
    """
    vector_dim, vdim = w1.shape
    assert w2.shape == (vdim, vector_dim)

    vdim_p = _round_up(vdim, 128)
    vec_p = _round_up(vector_dim, 128)

    w1t = jnp.pad(w1.astype(compute_dtype).T,
                  ((0, vdim_p - vdim), (0, vec_p - vector_dim)))
    w2t = jnp.pad(w2.astype(compute_dtype).T,
                  ((0, vec_p - vector_dim), (0, vdim_p - vdim)))
    return {
        "w1t": w1t, "w2t": w2t,
        "vdim": vdim, "vector_dim": vector_dim,
        "vdim_p": vdim_p, "vec_p": vec_p,
        "compute_dtype": compute_dtype,
    }


def net_forward_prepared(x, params, *, batch_tile=None):
    """Hot path: y = (x @ W1^T) @ W2^T with pre-padded/transposed weights."""
    B, vdim = x.shape
    assert vdim == params["vdim"]
    vdim_p, vec_p = params["vdim_p"], params["vec_p"]
    w1t, w2t = params["w1t"], params["w2t"]
    compute_dtype = params["compute_dtype"]

    cap = _tpu_vmem_capacity_bytes()
    vmem_limit = _vmem_limit_bytes(cap)
    if batch_tile is None:
        batch_tile = _default_batch_tile(cap)

    x_itemsize = jnp.dtype(x.dtype).itemsize
    w_itemsize = jnp.dtype(compute_dtype).itemsize

    # Hidden (vec) axis tiling so weights need not be fully VMEM-resident.
    tvec = _pick_vec_tile(vec_p, vdim_p, w_itemsize,
                          weight_budget=vmem_limit // 2)
    # Batch: pad only to a sublane multiple of 8; the (possibly ragged) last
    # batch tile is handled by the grid, not by padding B to a TB multiple.
    b8 = _round_up(B, 8)
    tb = _pick_batch_tile(batch_tile, b8, vdim_p, tvec, vec_p,
                          x_itemsize, x_itemsize, w_itemsize, vmem_limit)

    if (b8, vdim_p) != (B, vdim):
        x = jnp.pad(x, ((0, b8 - B), (0, vdim_p - vdim)))

    nb = pl.cdiv(b8, tb)
    nv = vec_p // tvec

    flops = 4 * b8 * vdim_p * vec_p  # two matmuls, 2*M*N*K each
    bytes_accessed = (x.size * x_itemsize
                      + (w1t.size + w2t.size) * w_itemsize
                      + b8 * vdim_p * x_itemsize)

    kernel = functools.partial(_mlp_kernel, compute_dtype=compute_dtype)

    def run(weight_pipeline):
        wkw = {} if weight_pipeline is None else {"pipeline_mode": weight_pipeline}
        return pl.pallas_call(
            kernel,
            out_shape=jax.ShapeDtypeStruct((b8, vdim_p), x.dtype),
            grid=(nb, nv),
            in_specs=[
                pl.BlockSpec((tb, vdim_p), lambda i, j: (i, 0)),           # x
                pl.BlockSpec((vdim_p, tvec), lambda i, j: (0, j), **wkw),  # W1^T
                pl.BlockSpec((tvec, vdim_p), lambda i, j: (j, 0), **wkw),  # W2^T
            ],
            out_specs=pl.BlockSpec((tb, vdim_p), lambda i, j: (i, 0)),
            scratch_shapes=[pltpu.VMEM((tb, vdim_p), jnp.float32)],
            compiler_params=pltpu.CompilerParams(
                dimension_semantics=("parallel", "arbitrary"),
                vmem_limit_bytes=vmem_limit,
            ),
            cost_estimate=pl.CostEstimate(
                flops=flops, transcendentals=0,
                bytes_accessed=bytes_accessed),
        )(x, w1t, w2t)

    if nv == 1:
        # Weight blocks never change -> single-buffer them (halves resident
        # weight VMEM; matters on v7x's 64 MiB).  Fall back if unsupported.
        try:
            out = run(pl.Buffered(1))
        except Exception:
            out = run(None)
    else:
        out = run(None)

    # strip batch / feature padding
    return out[:B, :vdim]


def net_forward(x, w1, w2, *, compute_dtype=jnp.bfloat16, batch_tile=None):
    """Convenience wrapper; for repeated calls, hoist prepare_params()."""
    params = prepare_params(w1, w2, compute_dtype=compute_dtype)
    return net_forward_prepared(x, params, batch_tile=batch_tile)


if __name__ == "__main__":
    # Small shapes consistent with Net(vdim, vector_dim)
    B, vdim, vector_dim = 8, 32, 16

    key = jax.random.PRNGKey(0)
    kx, k1, k2 = jax.random.split(key, 3)

    x = jax.random.normal(kx, (B, vdim), dtype=jnp.float32)
    # Deterministic params (shapes follow torch.nn.Linear: (out, in))
    w1 = jax.random.normal(k1, (vector_dim, vdim), dtype=jnp.float32) * 0.1
    w2 = jax.random.normal(k2, (vdim, vector_dim), dtype=jnp.float32) * 0.1

    params = prepare_params(w1, w2)          # one-time, hoisted out of hot path
    y = net_forward_prepared(x, params)
    jax.block_until_ready(y)

    # Reference (module semantics, f32).  Kernel feeds the MXU bf16 with f32
    # accumulation, so allow bf16-level tolerance.
    y_ref = (x @ w1.T) @ w2.T
    assert y.shape == y_ref.shape, "shape mismatch vs reference"
    assert jnp.allclose(y, y_ref, atol=3e-2, rtol=3e-2), "mismatch vs reference"

    print("KERNEL_OK")
</pallas_src>

<mosaic_0001>
module attributes {stable_mosaic.version = 11 : i64} {
  func.func @_mlp_kernel(%arg0: i32, %arg1: i32, %arg2: memref<8x128xf32, #tpu.memory_space<vmem>>, %arg3: memref<128x128xbf16, #tpu.memory_space<vmem>>, %arg4: memref<128x128xbf16, #tpu.memory_space<vmem>>, %arg5: memref<8x128xf32, #tpu.memory_space<vmem>>, %arg6: memref<8x128xf32, #tpu.memory_space<vmem>>) attributes {dimension_semantics = [#tpu.dimension_semantics<parallel>, #tpu.dimension_semantics<arbitrary>], iteration_bounds = array<i64: 1, 1>, scalar_prefetch = 0 : i64, scratch_operands = 1 : i64, tpu.core_type = #tpu.core_type<tc>, window_params = [{transform_indices = @transform_0, window_bounds = array<i64: 8, 128>}, {pipeline_mode = #tpu.pipeline_mode<synchronous>, transform_indices = @transform_1, window_bounds = array<i64: 128, 128>}, {pipeline_mode = #tpu.pipeline_mode<synchronous>, transform_indices = @transform_2, window_bounds = array<i64: 128, 128>}, {transform_indices = @transform_3, window_bounds = array<i64: 8, 128>}]} {
    %c0_i32 = arith.constant 0 : i32
    %0 = arith.cmpi eq, %arg1, %c0_i32 : i32
    %1 = arith.extui %0 : i1 to i32
    %c0_i32_0 = arith.constant 0 : i32
    %2 = arith.cmpi ne, %1, %c0_i32_0 : i32
    scf.if %2 {
      %cst_13 = arith.constant 0.000000e+00 : f32
      %16 = vector.broadcast %cst_13 : f32 to vector<8x128xf32>
      %c0_14 = arith.constant 0 : index
      %c0_15 = arith.constant 0 : index
      %17 = vector.load %arg6[%c0_14, %c0_15] : memref<8x128xf32, #tpu.memory_space<vmem>>, vector<8x128xf32>
      tpu.vector_store %arg6[%c0_14, %c0_15], %16 {strides = array<i32>} : memref<8x128xf32, #tpu.memory_space<vmem>>, vector<8x128xf32>,
    } else {
    }
    %c0 = arith.constant 0 : index
    %c0_1 = arith.constant 0 : index
    %3 = vector.load %arg2[%c0, %c0_1] : memref<8x128xf32, #tpu.memory_space<vmem>>, vector<8x128xf32>
    %4 = arith.truncf %3 : vector<8x128xf32> to vector<8x128xbf16>
    %c0_2 = arith.constant 0 : index
    %c0_3 = arith.constant 0 : index
    %5 = vector.load %arg3[%c0_2, %c0_3] : memref<128x128xbf16, #tpu.memory_space<vmem>>, vector<128x128xbf16>
    %cst = arith.constant dense<0.000000e+00> : vector<8x128xf32>
    %6 = tpu.matmul %4, %5, %cst {dimension_numbers = #tpu.dot_dimension_numbers<[1], [0], [0], [1], [0, 0, 1, 1], [], []>} : vector<8x128xbf16>, vector<128x128xbf16>, vector<8x128xf32> -> vector<8x128xf32>
    %c0_4 = arith.constant 0 : index
    %c0_5 = arith.constant 0 : index
    %7 = vector.load %arg6[%c0_4, %c0_5] : memref<8x128xf32, #tpu.memory_space<vmem>>, vector<8x128xf32>
    %8 = arith.truncf %6 : vector<8x128xf32> to vector<8x128xbf16>
    %c0_6 = arith.constant 0 : index
    %c0_7 = arith.constant 0 : index
    %9 = vector.load %arg4[%c0_6, %c0_7] : memref<128x128xbf16, #tpu.memory_space<vmem>>, vector<128x128xbf16>
    %cst_8 = arith.constant dense<0.000000e+00> : vector<8x128xf32>
    %10 = tpu.matmul %8, %9, %cst_8 {dimension_numbers = #tpu.dot_dimension_numbers<[1], [0], [0], [1], [0, 0, 1, 1], [], []>} : vector<8x128xbf16>, vector<128x128xbf16>, vector<8x128xf32> -> vector<8x128xf32>
    %11 = arith.addf %7, %10 : vector<8x128xf32>
    %c0_9 = arith.constant 0 : index
    %c0_10 = arith.constant 0 : index
    %12 = vector.load %arg6[%c0_9, %c0_10] : memref<8x128xf32, #tpu.memory_space<vmem>>, vector<8x128xf32>
    tpu.vector_store %arg6[%c0_9, %c0_10], %11 {strides = array<i32>} : memref<8x128xf32, #tpu.memory_space<vmem>>, vector<8x128xf32>,
    %c0_i32_11 = arith.constant 0 : i32
    %13 = arith.cmpi eq, %arg1, %c0_i32_11 : i32
    %14 = arith.extui %13 : i1 to i32
    %c0_i32_12 = arith.constant 0 : i32
    %15 = arith.cmpi ne, %14, %c0_i32_12 : i32
    scf.if %15 {
      %c0_13 = arith.constant 0 : index
      %c0_14 = arith.constant 0 : index
      %16 = vector.load %arg6[%c0_13, %c0_14] : memref<8x128xf32, #tpu.memory_space<vmem>>, vector<8x128xf32>
      %c0_15 = arith.constant 0 : index
      %c0_16 = arith.constant 0 : index
      %17 = vector.load %arg5[%c0_15, %c0_16] : memref<8x128xf32, #tpu.memory_space<vmem>>, vector<8x128xf32>
      tpu.vector_store %arg5[%c0_15, %c0_16], %16 {strides = array<i32>} : memref<8x128xf32, #tpu.memory_space<vmem>>, vector<8x128xf32>,
    } else {
    }
    return
  }
  func.func @transform_0(%arg0: i32, %arg1: i32) -> (i32, i32) {
    %c0_i32 = arith.constant 0 : i32
    %c0_i32_0 = arith.constant 0 : i32
    return %arg0, %c0_i32 : i32, i32
  }
  func.func @transform_1(%arg0: i32, %arg1: i32) -> (i32, i32) {
    %c0_i32 = arith.constant 0 : i32
    %c0_i32_0 = arith.constant 0 : i32
    return %c0_i32, %arg1 : i32, i32
  }
  func.func @transform_2(%arg0: i32, %arg1: i32) -> (i32, i32) {
    %c0_i32 = arith.constant 0 : i32
    %c0_i32_0 = arith.constant 0 : i32
    return %arg1, %c0_i32 : i32, i32
  }
  func.func @transform_3(%arg0: i32, %arg1: i32) -> (i32, i32) {
    %c0_i32 = arith.constant 0 : i32
    %c0_i32_0 = arith.constant 0 : i32
    return %arg0, %c0_i32 : i32, i32
  }
}

module attributes {stable_mosaic.version = 11 : i64} {
  func.func @_mlp_kernel(%arg0: i32, %arg1: i32, %arg2: memref<8x128xf32, #tpu.memory_space<vmem>>, %arg3: memref<128x128xbf16, #tpu.memory_space<vmem>>, %arg4: memref<128x128xbf16, #tpu.memory_space<vmem>>, %arg5: memref<8x128xf32, #tpu.memory_space<vmem>>, %arg6: memref<8x128xf32, #tpu.memory_space<vmem>>) attributes {dimension_semantics = [#tpu.dimension_semantics<parallel>, #tpu.dimension_semantics<arbitrary>], iteration_bounds = array<i64: 1, 1>, scalar_prefetch = 0 : i64, scratch_operands = 1 : i64, tpu.core_type = #tpu.core_type<tc>, window_params = [{transform_indices = @transform_0, window_bounds = array<i64: 8, 128>}, {transform_indices = @transform_1, window_bounds = array<i64: 128, 128>}, {transform_indices = @transform_2, window_bounds = array<i64: 128, 128>}, {transform_indices = @transform_3, window_bounds = array<i64: 8, 128>}]} {
    %c0_i32 = arith.constant 0 : i32
    %0 = arith.cmpi eq, %arg1, %c0_i32 : i32
    %1 = arith.extui %0 : i1 to i32
    %c0_i32_0 = arith.constant 0 : i32
    %2 = arith.cmpi ne, %1, %c0_i32_0 : i32
    scf.if %2 {
      %cst_13 = arith.constant 0.000000e+00 : f32
      %16 = vector.broadcast %cst_13 : f32 to vector<8x128xf32>
      %c0_14 = arith.constant 0 : index
      %c0_15 = arith.constant 0 : index
      %17 = vector.load %arg6[%c0_14, %c0_15] : memref<8x128xf32, #tpu.memory_space<vmem>>, vector<8x128xf32>
      tpu.vector_store %arg6[%c0_14, %c0_15], %16 {strides = array<i32>} : memref<8x128xf32, #tpu.memory_space<vmem>>, vector<8x128xf32>,
    } else {
    }
    %c0 = arith.constant 0 : index
    %c0_1 = arith.constant 0 : index
    %3 = vector.load %arg2[%c0, %c0_1] : memref<8x128xf32, #tpu.memory_space<vmem>>, vector<8x128xf32>
    %4 = arith.truncf %3 : vector<8x128xf32> to vector<8x128xbf16>
    %c0_2 = arith.constant 0 : index
    %c0_3 = arith.constant 0 : index
    %5 = vector.load %arg3[%c0_2, %c0_3] : memref<128x128xbf16, #tpu.memory_space<vmem>>, vector<128x128xbf16>
    %cst = arith.constant dense<0.000000e+00> : vector<8x128xf32>
    %6 = tpu.matmul %4, %5, %cst {dimension_numbers = #tpu.dot_dimension_numbers<[1], [0], [0], [1], [0, 0, 1, 1], [], []>} : vector<8x128xbf16>, vector<128x128xbf16>, vector<8x128xf32> -> vector<8x128xf32>
    %c0_4 = arith.constant 0 : index
    %c0_5 = arith.constant 0 : index
    %7 = vector.load %arg6[%c0_4, %c0_5] : memref<8x128xf32, #tpu.memory_space<vmem>>, vector<8x128xf32>
    %8 = arith.truncf %6 : vector<8x128xf32> to vector<8x128xbf16>
    %c0_6 = arith.constant 0 : index
    %c0_7 = arith.constant 0 : index
    %9 = vector.load %arg4[%c0_6, %c0_7] : memref<128x128xbf16, #tpu.memory_space<vmem>>, vector<128x128xbf16>
    %cst_8 = arith.constant dense<0.000000e+00> : vector<8x128xf32>
    %10 = tpu.matmul %8, %9, %cst_8 {dimension_numbers = #tpu.dot_dimension_numbers<[1], [0], [0], [1], [0, 0, 1, 1], [], []>} : vector<8x128xbf16>, vector<128x128xbf16>, vector<8x128xf32> -> vector<8x128xf32>
    %11 = arith.addf %7, %10 : vector<8x128xf32>
    %c0_9 = arith.constant 0 : index
    %c0_10 = arith.constant 0 : index
    %12 = vector.load %arg6[%c0_9, %c0_10] : memref<8x128xf32, #tpu.memory_space<vmem>>, vector<8x128xf32>
    tpu.vector_store %arg6[%c0_9, %c0_10], %11 {strides = array<i32>} : memref<8x128xf32, #tpu.memory_space<vmem>>, vector<8x128xf32>,
    %c0_i32_11 = arith.constant 0 : i32
    %13 = arith.cmpi eq, %arg1, %c0_i32_11 : i32
    %14 = arith.extui %13 : i1 to i32
    %c0_i32_12 = arith.constant 0 : i32
    %15 = arith.cmpi ne, %14, %c0_i32_12 : i32
    scf.if %15 {
      %c0_13 = arith.constant 0 : index
      %c0_14 = arith.constant 0 : index
      %16 = vector.load %arg6[%c0_13, %c0_14] : memref<8x128xf32, #tpu.memory_space<vmem>>, vector<8x128xf32>
      %c0_15 = arith.constant 0 : index
      %c0_16 = arith.constant 0 : index
      %17 = vector.load %arg5[%c0_15, %c0_16] : memref<8x128xf32, #tpu.memory_space<vmem>>, vector<8x128xf32>
      tpu.vector_store %arg5[%c0_15, %c0_16], %16 {strides = array<i32>} : memref<8x128xf32, #tpu.memory_space<vmem>>, vector<8x128xf32>,
    } else {
    }
    return
  }
  func.func @transform_0(%arg0: i32, %arg1: i32) -> (i32, i32) {
    %c0_i32 = arith.constant 0 : i32
    %c0_i32_0 = arith.constant 0 : i32
    return %arg0, %c0_i32 : i32, i32
  }
  func.func @transform_1(%arg0: i32, %arg1: i32) -> (i32, i32) {
    %c0_i32 = arith.constant 0 : i32
    %c0_i32_0 = arith.constant 0 : i32
    return %c0_i32, %arg1 : i32, i32
  }
  func.func @transform_2(%arg0: i32, %arg1: i32) -> (i32, i32) {
    %c0_i32 = arith.constant 0 : i32
    %c0_i32_0 = arith.constant 0 : i32
    return %arg1, %c0_i32 : i32, i32
  }
  func.func @transform_3(%arg0: i32, %arg1: i32) -> (i32, i32) {
    %c0_i32 = arith.constant 0 : i32
    %c0_i32_0 = arith.constant 0 : i32
    return %arg0, %c0_i32 : i32, i32
  }
}

</mosaic_0001>

<bundles_post_ra>
// kernel: tpu_custom_call.1
= control target key start
LH: loop header
LB: loop body
LE: loop exit
PB: predicated region body
PF: predicated region fallthrough
CT: control target
= control target key end

     0   :  { %8 = vsyncpa [#allocation4], 0  ;;  %s474_s0 = inlined_call_operand.hbm [shape: f32[8,128], index: 0, kind: input, shape index: {}]   ;;  %s475_s1 = inlined_call_operand.hbm [shape: bf16[128,128], index: 1, kind: input, shape index: {}]   ;;  %s476_s2 = inlined_call_operand.hbm [shape: bf16[128,128], index: 2, kind: input, shape index: {}]   ;;  %s477_s3 = inlined_call_operand.hbm [shape: f32[8,128], index: 3, kind: output, shape index: {}]  }
   0x1   :  { %9 = vsyncpa [#allocation7], 0  ;;  %s26_s14 = sshll.u32 %s475_s1, 4  ;;  %s27_s14 = int_to_ptr.hbm [resolvable:$true] %s26_s14 }
   0x2   :  { %10 = vsyncpa [#allocation5], 0  ;;  %s436_s15 = smov [#allocation6]   ;;  %s16_s19 = sshll.u32 %s474_s0, 4  ;;  %s17_s19 = int_to_ptr.hbm [resolvable:$true] %s16_s19 }
   0x3   :  { %s28_s16 = sshll.u32 %s436_s15, 4  ;;  %s437_s20 = smov 64   ;;  %s29_s16 = int_to_ptr.vmem [resolvable:$true] %s28_s16 }
   0x4   :  { %s438_s21 = smov 4   ;;  %s439_s22 = smov [#allocation3]  }
   0x5   :  { %34 = dma.hbm_to_vmem [thread:$0]  %s27_s14, 1024, %s29_s16, [#allocation7], %s437_s20, %s437_s20, %s438_s21  }
   0x6   :  { %s18_s23 = sshll.u32 %s439_s22, 4  ;;  %s39_s26 = sshll.u32 %s476_s2, 4  ;;  %s19_s23 = int_to_ptr.vmem [resolvable:$true] %s18_s23  ;;  %s40_s26 = int_to_ptr.hbm [resolvable:$true] %s39_s26 }
   0x7   :  { %21 = dma.hbm_to_vmem [thread:$0]  %s17_s19, 128, %s19_s23, [#allocation4]  }
   0x8   :  { %s440_s1 = smov [#allocation8]  }
   0x9   :  { %s41_s27 = sshll.u32 %s440_s1, 4  ;;  %s42_s27 = int_to_ptr.vmem [resolvable:$true] %s41_s27 }
   0xa   :  { %47 = dma.hbm_to_vmem [thread:$0]  %s40_s26, 1024, %s42_s27, [#allocation7], %s437_s20, %s437_s20, %s438_s21  }
   0xb   :  { %430 = dma.done.wait [#allocation4], 128  }
   0xc   :  { %431 = vsyncadd [#allocation4], 4294967168 }
   0xd   :  { %432 = dma.done.wait [#allocation7], 2048  }
   0xe   :  { %433 = vsyncadd [#allocation7], 4294965248  ;;  %v319_v0 = vld [vmem:[#allocation6 + $0x38] sm:$0xff]  ;;  %v318_v1 = vld [vmem:[#allocation6 + $0x30] sm:$0xff]  ;;  %s441_s0 = smov [#allocation9]   ;;  %s237_s30 = sshll.u32 %s477_s3, 4  ;;  %s238_s30 = int_to_ptr.hbm [resolvable:$true] %s237_s30 }
   0xf   :  { %131 = vmatpush.bf16.msra.mxu0 %v319_v0  ;;  %v327_v2 = vld [vmem:[#allocation8 + $0x38] sm:$0xff]  ;;  %v326_v3 = vld [vmem:[#allocation8 + $0x30] sm:$0xff]  ;;  %v317_v4 = vld [vmem:[#allocation6 + $0x28] sm:$0xff]  ;;  %s235_s2 = sshll.u32 %s441_s0, 4  ;;  %s236_s2 = int_to_ptr.vmem [resolvable:$true] %s235_s2 }
  0x10   :  { %210 = vmatpush.bf16.msra.mxu1 %v327_v2  ;;  %v325_v5 = vld [vmem:[#allocation8 + $0x28] sm:$0xff]  ;;  %v316_v6 = vld [vmem:[#allocation6 + $0x20] sm:$0xff]  ;;  %v315_v8 = vld [vmem:[#allocation6 + $0x18] sm:$0xff] }
  0x11   :  { %v324_v7 = vld [vmem:[#allocation8 + $0x20] sm:$0xff]  ;;  %v323_v9 = vld [vmem:[#allocation8 + $0x18] sm:$0xff]  ;;  %v314_v10 = vld [vmem:[#allocation6 + $0x10] sm:$0xff] }
  0x12   :  { %v322_v11 = vld [vmem:[#allocation8 + $0x10] sm:$0xff]  ;;  %v313_v12 = vld [vmem:[#allocation6 + $0x8] sm:$0xff]  ;;  %v312_v14 = vld [vmem:[#allocation6] sm:$0xff] }
  0x13   :  { %132 = vmatpush.bf16.msra.mxu0 %v318_v1  ;;  %v321_v13 = vld [vmem:[#allocation8 + $0x8] sm:$0xff]  ;;  %v65_v15 = vld [vmem:[#allocation3] sm:$0xff]  ;;  %v320_v17 = vld [vmem:[#allocation8] sm:$0xff] }
  0x14   :  { %211 = vmatpush.bf16.msra.mxu1 %v326_v3  ;;  %v66_v16 = vpack.c.bf16 %v65_v15, %v65_v15 }
  0x17   :  { %133 = vmatpush.bf16.msra.mxu0 %v317_v4 }
  0x18   :  { %212 = vmatpush.bf16.msra.mxu1 %v325_v5 }
  0x1b   :  { %134 = vmatpush.bf16.msra.mxu0 %v316_v6 }
  0x1c   :  { %213 = vmatpush.bf16.msra.mxu1 %v324_v7 }
  0x1f   :  { %135 = vmatpush.bf16.msra.mxu0 %v315_v8 }
  0x20   :  { %214 = vmatpush.bf16.msra.mxu1 %v323_v9 }
  0x23   :  { %136 = vmatpush.bf16.msra.mxu0 %v314_v10 }
  0x24   :  { %215 = vmatpush.bf16.msra.mxu1 %v322_v11 }
  0x27   :  { %137 = vmatpush.bf16.msra.mxu0 %v313_v12 }
  0x28   :  { %216 = vmatpush.bf16.msra.mxu1 %v321_v13 }
  0x2b   :  { %138 = vmatpush.bf16.msra.mxu0 %v312_v14 }
  0x2c   :  { %217 = vmatpush.bf16.msra.mxu1 %v320_v17 }
  0x2e   :  { %139 = vmatmul.bf16.vlgmr.msra.gmra.mxu0 %v66_v16 }
  0xab   :  { %v140_v18 = vpop.f32.mrf.mxu0 }
  0xac   :  { %v145_v19 = vpack.c.bf16 %v140_v18, %v140_v18 }
  0xae   :  { %218 = vmatmul.bf16.vlgmr.msra.gmra.mxu1 %v145_v19 }
  0xb3   :  { %v142_v20 = vpop.f32.mrf.mxu0 }
 0x12b   :  { %v219_v21 = vpop.f32.mrf.mxu1 }
 0x12c   :  { %229 = vst [vmem:[#allocation9] sm:$0xff] %v219_v21 }
 0x12d   :  { %240 = dma.vmem_to_hbm [thread:$0]  %s236_s2, 128, %s238_s30, [#allocation5]  }
 0x133   :  { %v221_v22 = vpop.f32.mrf.mxu1 }
 0x134   :  { %434 = dma.done.wait [#allocation5], 128  }
 0x135   :  { %435 = vsyncadd [#allocation5], 4294967168 }
 0x136   :  { %245 = vsyncpa [#allocation4], 1 }
 0x137   :  { %246 = vsyncpa [#allocation7], 1 }
 0x138   :  { %247 = vsyncpa [#allocation5], 1 }

// kernel: tpu_custom_call.1
= control target key start
LH: loop header
LB: loop body
LE: loop exit
PB: predicated region body
PF: predicated region fallthrough
CT: control target
= control target key end

     0   :  { %8 = vsyncpa [#allocation4], 0  ;;  %s474_s0 = inlined_call_operand.hbm [shape: f32[8,128], index: 0, kind: input, shape index: {}]   ;;  %s475_s1 = inlined_call_operand.hbm [shape: bf16[128,128], index: 1, kind: input, shape index: {}]   ;;  %s476_s2 = inlined_call_operand.hbm [shape: bf16[128,128], index: 2, kind: input, shape index: {}]   ;;  %s477_s3 = inlined_call_operand.hbm [shape: f32[8,128], index: 3, kind: output, shape index: {}]  }
   0x1   :  { %9 = vsyncpa [#allocation7], 0  ;;  %s26_s14 = sshll.u32 %s475_s1, 4  ;;  %s27_s14 = int_to_ptr.hbm [resolvable:$true] %s26_s14 }
   0x2   :  { %10 = vsyncpa [#allocation5], 0  ;;  %s436_s15 = smov [#allocation6]   ;;  %s16_s19 = sshll.u32 %s474_s0, 4  ;;  %s17_s19 = int_to_ptr.hbm [resolvable:$true] %s16_s19 }
   0x3   :  { %s28_s16 = sshll.u32 %s436_s15, 4  ;;  %s437_s20 = smov 64   ;;  %s29_s16 = int_to_ptr.vmem [resolvable:$true] %s28_s16 }
   0x4   :  { %s438_s21 = smov 4   ;;  %s439_s22 = smov [#allocation3]  }
   0x5   :  { %34 = dma.hbm_to_vmem [thread:$0]  %s27_s14, 1024, %s29_s16, [#allocation7], %s437_s20, %s437_s20, %s438_s21  }
   0x6   :  { %s18_s23 = sshll.u32 %s439_s22, 4  ;;  %s39_s26 = sshll.u32 %s476_s2, 4  ;;  %s19_s23 = int_to_ptr.vmem [resolvable:$true] %s18_s23  ;;  %s40_s26 = int_to_ptr.hbm [resolvable:$true] %s39_s26 }
   0x7   :  { %21 = dma.hbm_to_vmem [thread:$0]  %s17_s19, 128, %s19_s23, [#allocation4]  }
   0x8   :  { %s440_s1 = smov [#allocation8]  }
   0x9   :  { %s41_s27 = sshll.u32 %s440_s1, 4  ;;  %s42_s27 = int_to_ptr.vmem [resolvable:$true] %s41_s27 }
   0xa   :  { %47 = dma.hbm_to_vmem [thread:$0]  %s40_s26, 1024, %s42_s27, [#allocation7], %s437_s20, %s437_s20, %s438_s21  }
   0xb   :  { %430 = dma.done.wait [#allocation4], 128  }
   0xc   :  { %431 = vsyncadd [#allocation4], 4294967168 }
   0xd   :  { %432 = dma.done.wait [#allocation7], 2048  }
   0xe   :  { %433 = vsyncadd [#allocation7], 4294965248  ;;  %v319_v0 = vld [vmem:[#allocation6 + $0x38] sm:$0xff]  ;;  %v318_v1 = vld [vmem:[#allocation6 + $0x30] sm:$0xff]  ;;  %s441_s0 = smov [#allocation9]   ;;  %s237_s30 = sshll.u32 %s477_s3, 4  ;;  %s238_s30 = int_to_ptr.hbm [resolvable:$true] %s237_s30 }
   0xf   :  { %131 = vmatpush.bf16.msra.mxu0 %v319_v0  ;;  %v327_v2 = vld [vmem:[#allocation8 + $0x38] sm:$0xff]  ;;  %v326_v3 = vld [vmem:[#allocation8 + $0x30] sm:$0xff]  ;;  %v317_v4 = vld [vmem:[#allocation6 + $0x28] sm:$0xff]  ;;  %s235_s2 = sshll.u32 %s441_s0, 4  ;;  %s236_s2 = int_to_ptr.vmem [resolvable:$true] %s235_s2 }
  0x10   :  { %210 = vmatpush.bf16.msra.mxu1 %v327_v2  ;;  %v325_v5 = vld [vmem:[#allocation8 + $0x28] sm:$0xff]  ;;  %v316_v6 = vld [vmem:[#allocation6 + $0x20] sm:$0xff]  ;;  %v315_v8 = vld [vmem:[#allocation6 + $0x18] sm:$0xff] }
  0x11   :  { %v324_v7 = vld [vmem:[#allocation8 + $0x20] sm:$0xff]  ;;  %v323_v9 = vld [vmem:[#allocation8 + $0x18] sm:$0xff]  ;;  %v314_v10 = vld [vmem:[#allocation6 + $0x10] sm:$0xff] }
  0x12   :  { %v322_v11 = vld [vmem:[#allocation8 + $0x10] sm:$0xff]  ;;  %v313_v12 = vld [vmem:[#allocation6 + $0x8] sm:$0xff]  ;;  %v312_v14 = vld [vmem:[#allocation6] sm:$0xff] }
  0x13   :  { %132 = vmatpush.bf16.msra.mxu0 %v318_v1  ;;  %v321_v13 = vld [vmem:[#allocation8 + $0x8] sm:$0xff]  ;;  %v65_v15 = vld [vmem:[#allocation3] sm:$0xff]  ;;  %v320_v17 = vld [vmem:[#allocation8] sm:$0xff] }
  0x14   :  { %211 = vmatpush.bf16.msra.mxu1 %v326_v3  ;;  %v66_v16 = vpack.c.bf16 %v65_v15, %v65_v15 }
  0x17   :  { %133 = vmatpush.bf16.msra.mxu0 %v317_v4 }
  0x18   :  { %212 = vmatpush.bf16.msra.mxu1 %v325_v5 }
  0x1b   :  { %134 = vmatpush.bf16.msra.mxu0 %v316_v6 }
  0x1c   :  { %213 = vmatpush.bf16.msra.mxu1 %v324_v7 }
  0x1f   :  { %135 = vmatpush.bf16.msra.mxu0 %v315_v8 }
  0x20   :  { %214 = vmatpush.bf16.msra.mxu1 %v323_v9 }
  0x23   :  { %136 = vmatpush.bf16.msra.mxu0 %v314_v10 }
  0x24   :  { %215 = vmatpush.bf16.msra.mxu1 %v322_v11 }
  0x27   :  { %137 = vmatpush.bf16.msra.mxu0 %v313_v12 }
  0x28   :  { %216 = vmatpush.bf16.msra.mxu1 %v321_v13 }
  0x2b   :  { %138 = vmatpush.bf16.msra.mxu0 %v312_v14 }
  0x2c   :  { %217 = vmatpush.bf16.msra.mxu1 %v320_v17 }
  0x2e   :  { %139 = vmatmul.bf16.vlgmr.msra.gmra.mxu0 %v66_v16 }
  0xab   :  { %v140_v18 = vpop.f32.mrf.mxu0 }
  0xac   :  { %v145_v19 = vpack.c.bf16 %v140_v18, %v140_v18 }
  0xae   :  { %218 = vmatmul.bf16.vlgmr.msra.gmra.mxu1 %v145_v19 }
  0xb3   :  { %v142_v20 = vpop.f32.mrf.mxu0 }
 0x12b   :  { %v219_v21 = vpop.f32.mrf.mxu1 }
 0x12c   :  { %229 = vst [vmem:[#allocation9] sm:$0xff] %v219_v21 }
 0x12d   :  { %240 = dma.vmem_to_hbm [thread:$0]  %s236_s2, 128, %s238_s30, [#allocation5]  }
 0x133   :  { %v221_v22 = vpop.f32.mrf.mxu1 }
 0x134   :  { %434 = dma.done.wait [#allocation5], 128  }
 0x135   :  { %435 = vsyncadd [#allocation5], 4294967168 }
 0x136   :  { %245 = vsyncpa [#allocation4], 1 }
 0x137   :  { %246 = vsyncpa [#allocation7], 1 }
 0x138   :  { %247 = vsyncpa [#allocation5], 1 }

</bundles_post_ra>
